<compile_context>
chip_gen: v5e
topology: v5e:2x2
jax: 0.10.0
libtpu: 0.0.40
codegen_flags: <defaults>
</compile_context>

<pallas_src>
import jax
import jax.numpy as jnp
from jax.experimental import pallas as pl
from jax.experimental.pallas import tpu as pltpu


def marc_kernel(x_ref, w1t_ref, wh_ref, bh_ref, out_ref, feat_ref):
    # x_ref   : (TB, C, Lc)  f32   input tile, native (batch, channel, seq) layout
    # w1t_ref : (H, C)       bf16  encoder weights, pre-transposed (K = C on lanes)
    # wh_ref  : (H, NCP)     bf16  calibrated head = (w_fc^T * omega) / L, lane-padded
    # bh_ref  : (1, NCP)     f32   calibrated bias = omega*b_fc + beta*||w_fc||
    # out_ref : (TB, NCP)    f32   resident across the L axis; written on last L step
    # feat_ref: (TB, H)      f32   pooled-feature accumulator (VMEM scratch)
    li = pl.program_id(1)

    @pl.when(li == 0)
    def _init():
        feat_ref[...] = jnp.zeros_like(feat_ref)

    tb, _, _ = x_ref.shape
    h_dim, c_dim = w1t_ref.shape

    # In-kernel bf16 cast (no HBM round trip).  Batched matmul in the
    # MXU-natural orientation: lhs (TB, H, C) has K=C on lanes, rhs (TB, C, Lc)
    # has K=C on sublanes and N=Lc on lanes -> no transposes / relayouts.
    xb = x_ref[...].astype(jnp.bfloat16)                               # (TB, C, Lc)
    w1b = jnp.broadcast_to(w1t_ref[...][None, :, :], (tb, h_dim, c_dim))
    # TODO(synk): if C is tiny (<~32) a VPU broadcast-FMA over C would fill the
    # MXU contraction dim better; kept on the MXU for generality.
    h = jnp.einsum('bhc,bcl->bhl', w1b, xb,
                   preferred_element_type=jnp.float32)                 # (TB, H, Lc)
    h = jnp.maximum(h, 0.0)                                            # ReLU (f32)

    # Partial global pool (sum over this Lc chunk); the 1/L of the mean is
    # folded into wh on the host.
    feat_ref[...] += jnp.sum(h, axis=-1)                               # (TB, H)

    @pl.when(li == pl.num_programs(1) - 1)
    def _finalize():
        # Calibrated classifier head: omega/beta/||w_fc||/b_fc/1/L already
        # folded host-side, so the MARC epilogue is one matmul + broadcast add.
        feat = feat_ref[...].astype(jnp.bfloat16)
        out_ref[...] = jnp.dot(feat, wh_ref[...],
                               preferred_element_type=jnp.float32) + bh_ref[...]


def _vmem_capacity_bytes():
    try:
        return int(pltpu.get_tpu_info().vmem_capacity_bytes)
    except Exception:
        return 64 * 1024 * 1024        # conservative fallback (v7x per-core VMEM)


def _choose_tiles(B, C, L, H, NCP, budget_bytes):
    """Pick (tb, lc) so the per-step working set fits the VMEM byte budget."""

    def per_tb_bytes(lc):
        return (2 * C * lc * 4         # double-buffered f32 x tile
                + C * lc * 2           # in-kernel bf16 copy of the x tile
                + C * H * 2            # in-kernel broadcast copy of W1^T
                + 2 * H * lc * 4       # f32 h intermediate (+ relu temporary)
                + H * 4                # feat accumulator row
                + 2 * NCP * 4)         # double-buffered f32 out tile

    fixed = 2 * (C * H * 2 + H * NCP * 2 + NCP * 4)   # resident weights / bias

    # Sequence chunk: full L unless even the minimum batch tile (8) would not
    # fit; then the largest multiple-of-128 divisor of L that fits (the x
    # block's last dim must be a multiple of 128 or the full extent).
    lc = L
    if fixed + 8 * per_tb_bytes(L) > budget_bytes:
        for cand in (2048, 1024, 512, 256, 128):
            if L % cand == 0 and fixed + 8 * per_tb_bytes(cand) <= budget_bytes:
                lc = cand
                break
        # TODO(synk): add in-kernel tail masking so lc chunking also applies
        # when L has no multiple-of-128 divisor.

    # Batch tile: biggest multiple of 8 inside the budget, capped so large
    # batches still give >=4 grid blocks (pipelining / 2 TensorCores on v7x).
    tb = (budget_bytes - fixed) // per_tb_bytes(lc)
    tb = max(8, (tb // 8) * 8)
    tb = min(tb, 512)
    tb = min(tb, max(8, (pl.cdiv(B, 4) // 8) * 8))
    # Prefer a tb that divides B so no phantom padded rows are DMA'd/matmul'd.
    for cand in range(tb, max(7, tb // 2 - 1), -8):
        if B % cand == 0:
            tb = cand
            break
    return tb, lc


def marc_forward(x_bcl, w1, w_fc, b_fc, omega, beta, *, tb=None, lc=None):
    """x_bcl: (B, C, L) float32 — the PyTorch (batch, channels, seq_len) layout."""
    B, C, L = x_bcl.shape
    H = w1.shape[1]
    NC = w_fc.shape[0]
    NCP = ((NC + 127) // 128) * 128            # lane-dense padded num_classes

    # ------------- host-side folding of the frozen parameters ---------------
    # omega*(mean_l relu(x W1) @ w_fc^T + b_fc) + beta*||w_fc||
    #   = sum_l relu(x W1) @ [(w_fc^T * omega)/L] + [omega*b_fc + beta*||w_fc||]
    w_fc32 = w_fc.astype(jnp.float32)
    omega32 = omega.reshape(1, NC).astype(jnp.float32)
    beta32 = beta.reshape(1, NC).astype(jnp.float32)
    w_norm = jnp.sqrt(jnp.sum(w_fc32 * w_fc32, axis=1)).reshape(1, NC)
    w_head = (w_fc32.T * omega32) / jnp.float32(L)                     # (H, NC)
    b_head = omega32 * b_fc.reshape(1, NC).astype(jnp.float32) + beta32 * w_norm
    w_head = jnp.pad(w_head, ((0, 0), (0, NCP - NC))).astype(jnp.bfloat16)
    b_head = jnp.pad(b_head, ((0, 0), (0, NCP - NC)))                  # (1, NCP) f32
    w1t = w1.T.astype(jnp.bfloat16)                                    # (H, C)

    # ------------------------- tiling / VMEM budget -------------------------
    vmem_cap = _vmem_capacity_bytes()          # 128 MiB v5e/v6e, 64 MiB v7x
    budget = int(vmem_cap * 0.55)              # headroom for compiler temporaries
    auto_tb, auto_lc = _choose_tiles(B, C, L, H, NCP, budget)
    tb = auto_tb if tb is None else tb
    lc = auto_lc if lc is None else lc

    b_pad = pl.cdiv(B, tb) * tb
    x_in = x_bcl
    if b_pad != B:
        # Only hit when B has no multiple-of-8 divisor near tb (e.g. tiny demo
        # batches); otherwise x is fed to the kernel untouched (no HBM copy).
        x_in = jnp.pad(x_bcl, ((0, b_pad - B), (0, 0), (0, 0)))

    grid = (b_pad // tb, L // lc)
    out = pl.pallas_call(
        marc_kernel,
        out_shape=jax.ShapeDtypeStruct((b_pad, NCP), jnp.float32),
        grid_spec=pltpu.PrefetchScalarGridSpec(
            num_scalar_prefetch=0,
            grid=grid,
            in_specs=[
                pl.BlockSpec((tb, C, lc), lambda b, l: (b, 0, l)),  # x (native layout)
                pl.BlockSpec((H, C),      lambda b, l: (0, 0)),     # W1^T
                pl.BlockSpec((H, NCP),    lambda b, l: (0, 0)),     # calibrated head
                pl.BlockSpec((1, NCP),    lambda b, l: (0, 0)),     # calibrated bias
            ],
            out_specs=pl.BlockSpec((tb, NCP), lambda b, l: (b, 0)),
            scratch_shapes=[pltpu.VMEM((tb, H), jnp.float32)],
        ),
        compiler_params=pltpu.CompilerParams(
            dimension_semantics=("parallel", "arbitrary"),
            vmem_limit_bytes=min(int(vmem_cap * 0.85), 100 * 1024 * 1024)),
    )(x_in, w1t, w_head, b_head)

    # TODO(synk): for real deployments feed bf16 activations straight from the
    # upstream producer to halve the streamed x bytes again.
    return out[:B, :NC]


def _reference(x_bcl, w1, w_fc, b_fc, omega, beta):
    """Pure-JAX f32 reference with the original op order (PyTorch semantics)."""
    x_blc = jnp.transpose(x_bcl, (0, 2, 1))
    h = jax.nn.relu(jnp.einsum('blc,ch->blh', x_blc, w1,
                               precision=jax.lax.Precision.HIGHEST))
    feat = jnp.mean(h, axis=1)
    logits = jnp.dot(feat, w_fc.T, precision=jax.lax.Precision.HIGHEST) + b_fc
    w_norm = jnp.linalg.norm(w_fc, axis=1)
    return omega * logits + beta * w_norm


if __name__ == "__main__":
    B, C, L = 2, 4, 16          # (batch, input_channels, sequence_length)
    H, NC = 32, 8               # hidden width, num_classes

    key = jax.random.PRNGKey(0)
    kx, k1, k2, k3, ko, kb = jax.random.split(key, 6)

    x = jax.random.normal(kx, (B, C, L), dtype=jnp.float32)

    # Deterministic synthetic parameters (base model frozen; omega/beta as in
    # __init__: ones / zeros, perturbed slightly so the affine is non-trivial).
    w1 = jax.random.normal(k1, (C, H), dtype=jnp.float32) * 0.1
    w_fc = jax.random.normal(k2, (NC, H), dtype=jnp.float32) * 0.1
    b_fc = jax.random.normal(k3, (NC,), dtype=jnp.float32) * 0.01
    omega = jnp.ones((1, NC), jnp.float32) + 0.05 * jax.random.normal(ko, (1, NC))
    beta = jnp.zeros((1, NC), jnp.float32) + 0.05 * jax.random.normal(kb, (1, NC))

    out = marc_forward(x, w1, w_fc, b_fc, omega, beta)
    out = jax.block_until_ready(out)

    ref = _reference(x, w1, w_fc, b_fc, omega, beta)
    assert out.shape == (B, NC)
    # bf16 MXU matmuls (f32 accumulation) + host-side parameter folding
    # => mixed-precision tolerance vs the pure-f32 reference.
    assert jnp.allclose(out, ref, atol=1e-2, rtol=2e-2), "mismatch vs reference"

    print("KERNEL_OK")
</pallas_src>

<mosaic_0001>
module attributes {stable_mosaic.version = 11 : i64} {
  func.func @marc_kernel(%arg0: i32, %arg1: i32, %arg2: memref<8x4x16xf32, #tpu.memory_space<vmem>>, %arg3: memref<32x4xbf16, #tpu.memory_space<vmem>>, %arg4: memref<32x128xbf16, #tpu.memory_space<vmem>>, %arg5: memref<1x128xf32, #tpu.memory_space<vmem>>, %arg6: memref<8x128xf32, #tpu.memory_space<vmem>>, %arg7: memref<8x32xf32, #tpu.memory_space<vmem>>) attributes {dimension_semantics = [#tpu.dimension_semantics<parallel>, #tpu.dimension_semantics<arbitrary>], iteration_bounds = array<i64: 1, 1>, scalar_prefetch = 0 : i64, scratch_operands = 1 : i64, tpu.core_type = #tpu.core_type<tc>, window_params = [{transform_indices = @transform_0, window_bounds = array<i64: 8, 4, 16>}, {pipeline_mode = #tpu.pipeline_mode<synchronous>, transform_indices = @transform_1, window_bounds = array<i64: 32, 4>}, {pipeline_mode = #tpu.pipeline_mode<synchronous>, transform_indices = @transform_2, window_bounds = array<i64: 32, 128>}, {pipeline_mode = #tpu.pipeline_mode<synchronous>, transform_indices = @transform_3, window_bounds = array<i64: 1, 128>}, {transform_indices = @transform_4, window_bounds = array<i64: 8, 128>}]} {
    %c0_i32 = arith.constant 0 : i32
    %0 = arith.cmpi eq, %arg1, %c0_i32 : i32
    %1 = arith.extui %0 : i1 to i32
    %c0_i32_0 = arith.constant 0 : i32
    %2 = arith.cmpi ne, %1, %c0_i32_0 : i32
    scf.if %2 {
      %cst_13 = arith.constant 0.000000e+00 : f32
      %19 = vector.broadcast %cst_13 : f32 to vector<8x32xf32>
      %c0_14 = arith.constant 0 : index
      %c0_15 = arith.constant 0 : index
      %20 = vector.load %arg7[%c0_14, %c0_15] : memref<8x32xf32, #tpu.memory_space<vmem>>, vector<8x32xf32>
      tpu.vector_store %arg7[%c0_14, %c0_15], %19 {strides = array<i32>} : memref<8x32xf32, #tpu.memory_space<vmem>>, vector<8x32xf32>,
    } else {
    }
    %c0 = arith.constant 0 : index
    %c0_1 = arith.constant 0 : index
    %c0_2 = arith.constant 0 : index
    %3 = vector.load %arg2[%c0, %c0_1, %c0_2] : memref<8x4x16xf32, #tpu.memory_space<vmem>>, vector<8x4x16xf32>
    %4 = arith.truncf %3 : vector<8x4x16xf32> to vector<8x4x16xbf16>
    %c0_3 = arith.constant 0 : index
    %c0_4 = arith.constant 0 : index
    %5 = vector.load %arg3[%c0_3, %c0_4] : memref<32x4xbf16, #tpu.memory_space<vmem>>, vector<32x4xbf16>
    %6 = vector.shape_cast %5 : vector<32x4xbf16> to vector<1x32x4xbf16>
    %7 = vector.shape_cast %6 : vector<1x32x4xbf16> to vector<1x32x4xbf16>
    %8 = vector.broadcast %7 : vector<1x32x4xbf16> to vector<8x32x4xbf16>
    "tpu.trace_start"() <{level = 10 : i32, message = "bhc,bcl->bhl"}> : () -> ()
    %cst = arith.constant dense<0.000000e+00> : vector<8x32x16xf32>
    %9 = tpu.matmul %8, %4, %cst {dimension_numbers = #tpu.dot_dimension_numbers<[2], [1], [1], [2], [0, 0, 0, 1, 1, 2], [0], [0]>} : vector<8x32x4xbf16>, vector<8x4x16xbf16>, vector<8x32x16xf32> -> vector<8x32x16xf32>
    "tpu.trace_stop"() : () -> ()
    %cst_5 = arith.constant 0.000000e+00 : f32
    %10 = vector.broadcast %cst_5 : f32 to vector<8x32x16xf32>
    %11 = arith.maximumf %9, %10 : vector<8x32x16xf32>
    %c0_6 = arith.constant 0 : index
    %c0_7 = arith.constant 0 : index
    %12 = vector.load %arg7[%c0_6, %c0_7] : memref<8x32xf32, #tpu.memory_space<vmem>>, vector<8x32xf32>
    %cst_8 = arith.constant dense<0.000000e+00> : vector<8x32xf32>
    %13 = vector.multi_reduction <add>, %11, %cst_8 [2] : vector<8x32x16xf32> to vector<8x32xf32>
    %14 = arith.addf %12, %13 : vector<8x32xf32>
    %c0_9 = arith.constant 0 : index
    %c0_10 = arith.constant 0 : index
    %15 = vector.load %arg7[%c0_9, %c0_10] : memref<8x32xf32, #tpu.memory_space<vmem>>, vector<8x32xf32>
    tpu.vector_store %arg7[%c0_9, %c0_10], %14 {strides = array<i32>} : memref<8x32xf32, #tpu.memory_space<vmem>>, vector<8x32xf32>,
    %c0_i32_11 = arith.constant 0 : i32
    %16 = arith.cmpi eq, %arg1, %c0_i32_11 : i32
    %17 = arith.extui %16 : i1 to i32
    %c0_i32_12 = arith.constant 0 : i32
    %18 = arith.cmpi ne, %17, %c0_i32_12 : i32
    scf.if %18 {
      %c0_13 = arith.constant 0 : index
      %c0_14 = arith.constant 0 : index
      %19 = vector.load %arg7[%c0_13, %c0_14] : memref<8x32xf32, #tpu.memory_space<vmem>>, vector<8x32xf32>
      %20 = arith.truncf %19 : vector<8x32xf32> to vector<8x32xbf16>
      %c0_15 = arith.constant 0 : index
      %c0_16 = arith.constant 0 : index
      %21 = vector.load %arg4[%c0_15, %c0_16] : memref<32x128xbf16, #tpu.memory_space<vmem>>, vector<32x128xbf16>
      %cst_17 = arith.constant dense<0.000000e+00> : vector<8x128xf32>
      %22 = tpu.matmul %20, %21, %cst_17 {dimension_numbers = #tpu.dot_dimension_numbers<[1], [0], [0], [1], [0, 0, 1, 1], [], []>} : vector<8x32xbf16>, vector<32x128xbf16>, vector<8x128xf32> -> vector<8x128xf32>
      %c0_18 = arith.constant 0 : index
      %c0_19 = arith.constant 0 : index
      %23 = vector.load %arg5[%c0_18, %c0_19] : memref<1x128xf32, #tpu.memory_space<vmem>>, vector<1x128xf32>
      %24 = vector.broadcast %23 : vector<1x128xf32> to vector<8x128xf32>
      %25 = arith.addf %22, %24 : vector<8x128xf32>
      %c0_20 = arith.constant 0 : index
      %c0_21 = arith.constant 0 : index
      %26 = vector.load %arg6[%c0_20, %c0_21] : memref<8x128xf32, #tpu.memory_space<vmem>>, vector<8x128xf32>
      tpu.vector_store %arg6[%c0_20, %c0_21], %25 {strides = array<i32>} : memref<8x128xf32, #tpu.memory_space<vmem>>, vector<8x128xf32>,
    } else {
    }
    return
  }
  func.func @transform_0(%arg0: i32, %arg1: i32) -> (i32, i32, i32) {
    %c0_i32 = arith.constant 0 : i32
    %c0_i32_0 = arith.constant 0 : i32
    return %arg0, %c0_i32, %arg1 : i32, i32, i32
  }
  func.func @transform_1(%arg0: i32, %arg1: i32) -> (i32, i32) {
    %c0_i32 = arith.constant 0 : i32
    %c0_i32_0 = arith.constant 0 : i32
    %c0_i32_1 = arith.constant 0 : i32
    return %c0_i32, %c0_i32_0 : i32, i32
  }
  func.func @transform_2(%arg0: i32, %arg1: i32) -> (i32, i32) {
    %c0_i32 = arith.constant 0 : i32
    %c0_i32_0 = arith.constant 0 : i32
    %c0_i32_1 = arith.constant 0 : i32
    return %c0_i32, %c0_i32_0 : i32, i32
  }
  func.func @transform_3(%arg0: i32, %arg1: i32) -> (i32, i32) {
    %c0_i32 = arith.constant 0 : i32
    %c0_i32_0 = arith.constant 0 : i32
    %c0_i32_1 = arith.constant 0 : i32
    return %c0_i32, %c0_i32_0 : i32, i32
  }
  func.func @transform_4(%arg0: i32, %arg1: i32) -> (i32, i32) {
    %c0_i32 = arith.constant 0 : i32
    %c0_i32_0 = arith.constant 0 : i32
    return %arg0, %c0_i32 : i32, i32
  }
}

</mosaic_0001>

<bundles_post_ra>
// kernel: tpu_custom_call.1
= control target key start
LH: loop header
LB: loop body
LE: loop exit
PB: predicated region body
PF: predicated region fallthrough
CT: control target
= control target key end

     0   :  { %9 = vsyncpa [#allocation4], 0  ;;  %s831_s0 = inlined_call_operand.hbm [shape: f32[8,4,16], index: 0, kind: input, shape index: {}]   ;;  %s832_s1 = inlined_call_operand.vmem [shape: bf16[32,4], index: 1, kind: input, shape index: {}]   ;;  %s833_s2 = inlined_call_operand.vmem [shape: bf16[32,128], index: 2, kind: input, shape index: {}]   ;;  %s834_s3 = inlined_call_operand.vmem [shape: f32[1,128], index: 3, kind: input, shape index: {}]   ;;  %s835_s4 = inlined_call_operand.hbm [shape: f32[8,128], index: 4, kind: output, shape index: {}]  }
   0x1   :  { %10 = vsyncpa [#allocation5], 0  ;;  %s15_s17 = sshll.u32 %s831_s0, 4  ;;  %s653_s18 = smov [#allocation3]   ;;  %s16_s17 = int_to_ptr.hbm [resolvable:$true] %s15_s17 }
   0x2   :  { %s17_s19 = sshll.u32 %s653_s18, 4  ;;  %s654_s20 = smov 64   ;;  %s18_s19 = int_to_ptr.vmem [resolvable:$true] %s17_s19 }
   0x3   :  { %s655_s21 = smov 4  }
   0x4   :  { %23 = dma.hbm_to_vmem [thread:$0]  %s16_s17, 512, %s18_s19, [#allocation4], %s654_s20, %s654_s20, %s655_s21  }
   0x5   :  { %649 = dma.done.wait [#allocation4], 512  }
   0x6   :  { %650 = vsyncadd [#allocation4], 4294966784  ;;  %vm78_vm0 = vcmask 1041408   ;;  %v41_v0 = vld [vmem:[#allocation3] sm:$0xf]  ;;  %vm71_vm1 = vcmask 31744  }
   0x7   :  { %v42_v1 = vld [vmem:[#allocation3 + $0x4] sm:$0xf]  ;;  %v43_v2 = vld [vmem:[#allocation3 + $0x8] sm:$0xf]  ;;  %v49_v3 = vpack.c.bf16 %v41_v0, %v41_v0  ;;  %v44_v6 = vld [vmem:[#allocation3 + $0xc] sm:$0xf] }
   0x8   :  { %v50_v4 = vpack.c.bf16 %v42_v1, %v42_v1  ;;  %v51_v5 = vpack.c.bf16 %v43_v2, %v43_v2  ;;  %v45_v7 = vld [vmem:[#allocation3 + $0x10] sm:$0xf]  ;;  %v52_v8 = vpack.c.bf16 %v44_v6, %v44_v6  ;;  %v46_v10 = vld [vmem:[#allocation3 + $0x14] sm:$0xf]  ;;  %v47_v11 = vld [vmem:[#allocation3 + $0x18] sm:$0xf] }
   0x9   :  { %v53_v9 = vpack.c.bf16 %v45_v7, %v45_v7  ;;  %v48_v12 = vld [vmem:[#allocation3 + $0x1c] sm:$0xf]  ;;  %v80_v13 = vsel %vm78_vm0, %v49_v3, 0  ;;  %v54_v17 = vpack.c.bf16 %v46_v10, %v46_v10  ;;  %v55_v20 = vpack.c.bf16 %v47_v11, %v47_v11  ;;  %v592_v25 = vld [vmem:[%s832_s1 + $0x8] sm:$0xff]  ;;  %s657_s29 = smov [#allocation6]   ;;  %s548_s7 = sshll.u32 %s835_s4, 4  ;;  %s549_s7 = int_to_ptr.hbm [resolvable:$true] %s548_s7 }
   0xa   :  { %v102_v14 = vsel %vm78_vm0, %v50_v4, 0  ;;  %v124_v15 = vsel %vm78_vm0, %v51_v5, 0  ;;  %v591_v16 = vld [vmem:[%s832_s1] sm:$0xff]  ;;  %89 = vmatpush.bf16.msra.mxu0 %v80_v13  ;;  %v146_v18 = vsel %vm78_vm0, %v52_v8, 0  ;;  %v56_v21 = vpack.c.bf16 %v48_v12, %v48_v12  ;;  %s546_s30 = sshll.u32 %s657_s29, 4  ;;  %s547_s30 = int_to_ptr.vmem [resolvable:$true] %s546_s30 }
   0xb   :  { %111 = vmatpush.bf16.msra.mxu1 %v102_v14  ;;  %v168_v19 = vsel %vm78_vm0, %v53_v9, 0  ;;  %133 = vmatpush.bf16.msra.mxu2 %v124_v15  ;;  %v190_v22 = vsel %vm78_vm0, %v54_v17, 0  ;;  %v212_v23 = vsel %vm78_vm0, %v55_v20, 0  ;;  %vm288_vm2 = vcmask 130048  }
   0xc   :  { %155 = vmatpush.bf16.msra.mxu3 %v146_v18  ;;  %v234_v24 = vsel %vm78_vm0, %v56_v21, 0  ;;  %vm422_vm3 = vcmask 130112   ;;  %vm426_vm4 = vcmask 195712   ;;  %vm430_vm5 = vcmask 261312  }
   0xd   :  { %566 = vmatmul.msk.bf16.vlgmr.msra.gmra.mxu0 %vm71_vm1, %v591_v16  ;;  %vm481_vm6 = vcmask 1041409   ;;  %vm483_vm7 = vcmask 1042434   ;;  %vm39_vm8 = vcmask 261120   ;;  %vm485_vm9 = vcmask 1043459  }
   0xe   :  { %177 = vmatpush.bf16.msrb.mxu0 %v168_v19  ;;  %568 = vmatmul.msk.bf16.vlgmr.msra.gmra.mxu1 %vm71_vm1, %v591_v16  ;;  %vm487_vm10 = vcmask 1044484   ;;  %vm489_vm11 = vcmask 1045509   ;;  %vm491_vm12 = vcmask 1046534   ;;  %vm493_vm13 = vcmask 1047559  }
   0xf   :  { %199 = vmatpush.bf16.msrb.mxu1 %v190_v22  ;;  %570 = vmatmul.msk.bf16.vlgmr.msra.gmra.mxu2 %vm71_vm1, %v591_v16 }
  0x10   :  { %572 = vmatmul.msk.bf16.vlgmr.msra.gmra.mxu3 %vm71_vm1, %v591_v16  ;;  %221 = vmatpush.bf16.msrb.mxu2 %v212_v23 }
  0x11   :  { %243 = vmatpush.bf16.msrb.mxu3 %v234_v24 }
  0x1d   :  { %567 = vmatmul.msk.bf16.gmra.mxu0 %vm71_vm1, %v592_v25 }
  0x1e   :  { %569 = vmatmul.msk.bf16.gmra.mxu1 %vm71_vm1, %v592_v25 }
  0x1f   :  { %571 = vmatmul.msk.bf16.gmra.mxu2 %vm71_vm1, %v592_v25 }
  0x20   :  { %573 = vmatmul.msk.bf16.gmra.mxu3 %vm71_vm1, %v592_v25 }
  0x2d   :  { %574 = vmatmul.msk.bf16.vlgmr.msrb.gmra.mxu0 %vm71_vm1, %v591_v16 }
  0x2e   :  { %576 = vmatmul.msk.bf16.vlgmr.msrb.gmra.mxu1 %vm71_vm1, %v591_v16 }
  0x2f   :  { %578 = vmatmul.msk.bf16.vlgmr.msrb.gmra.mxu2 %vm71_vm1, %v591_v16 }
  0x30   :  { %580 = vmatmul.msk.bf16.vlgmr.msrb.gmra.mxu3 %vm71_vm1, %v591_v16 }
  0x3d   :  { %575 = vmatmul.msk.bf16.gmra.mxu0 %vm71_vm1, %v592_v25 }
  0x3e   :  { %577 = vmatmul.msk.bf16.gmra.mxu1 %vm71_vm1, %v592_v25 }
  0x3f   :  { %579 = vmatmul.msk.bf16.gmra.mxu2 %vm71_vm1, %v592_v25 }
  0x40   :  { %581 = vmatmul.msk.bf16.gmra.mxu3 %vm71_vm1, %v592_v25 }
  0x8a   :  { %v91_v26 = vpop.f32.mrf.mxu0 }
  0x8b   :  { %v113_v27 = vpop.f32.mrf.mxu1  ;;  %v255_v28 = vmax.f32 %v91_v26, 0.0 }
  0x8c   :  { %v259_v29 = vmax.f32 %v113_v27, 0.0 }
  0x8d   :  { %v289_v31 = vsel %vm288_vm2, %v255_v28, 0.0 }
  0x8e   :  { %v301_v30 = vsel %vm288_vm2, %v259_v29, 0.0  ;;  %290 = vadd.xlane.f32.xlu0 %v289_v31 }
  0x8f   :  { %302 = vadd.xlane.f32.xlu1 %v301_v30 }
  0x92   :  { %v135_v32 = vpop.f32.mrf.mxu2  ;;  %v93_v36 = vpop.f32.mrf.mxu0 }
  0x93   :  { %v157_v33 = vpop.f32.mrf.mxu3  ;;  %v263_v34 = vmax.f32 %v135_v32, 0.0  ;;  %v115_v37 = vpop.f32.mrf.mxu1  ;;  %v256_v42 = vmax.f32 %v93_v36, 0.0 }
  0x94   :  { %v267_v35 = vmax.f32 %v157_v33, 0.0  ;;  %v260_v38 = vmax.f32 %v115_v37, 0.0 }
  0x95   :  { %v313_v40 = vsel %vm288_vm2, %v263_v34, 0.0  ;;  %v292_v50 = vsel %vm288_vm2, %v256_v42, 0.0 }
  0x96   :  { %v325_v39 = vsel %vm288_vm2, %v267_v35, 0.0  ;;  %v304_v41 = vsel %vm288_vm2, %v260_v38, 0.0  ;;  %314 = vadd.xlane.f32.xlu0 %v313_v40 }
  0x97   :  { %326 = vadd.xlane.f32.xlu2 %v325_v39  ;;  %305 = vadd.xlane.f32.xlu1 %v304_v41 }
  0x9a   :  { %v137_v43 = vpop.f32.mrf.mxu2  ;;  %v96_v46 = vpop.f32.mrf.mxu0 }
  0x9b   :  { %v159_v44 = vpop.f32.mrf.mxu3  ;;  %v264_v45 = vmax.f32 %v137_v43, 0.0  ;;  %v118_v47 = vpop.f32.mrf.mxu1  ;;  %v257_v48 = vmax.f32 %v96_v46, 0.0 }
  0x9c   :  { %v261_v52 = vmax.f32 %v118_v47, 0.0  ;;  %v268_v53 = vmax.f32 %v159_v44, 0.0 }
  0x9d   :  { %v316_v49 = vsel %vm288_vm2, %v264_v45, 0.0  ;;  %v295_v51 = vsel %vm288_vm2, %v257_v48, 0.0 }
  0x9e   :  { %293 = vadd.xlane.f32.xlu0 %v292_v50  ;;  %v307_v60 = vsel %vm288_vm2, %v261_v52, 0.0  ;;  %v328_v61 = vsel %vm288_vm2, %v268_v53, 0.0 }
  0x9f   :  { %317 = vadd.xlane.f32.xlu1 %v316_v49  ;;  %296 = vadd.xlane.f32.xlu2 %v295_v51 }
  0xa2   :  { %v140_v54 = vpop.f32.mrf.mxu2  ;;  %v98_v57 = vpop.f32.mrf.mxu0 }
  0xa3   :  { %v162_v55 = vpop.f32.mrf.mxu3  ;;  %v265_v56 = vmax.f32 %v140_v54, 0.0  ;;  %v120_v58 = vpop.f32.mrf.mxu1  ;;  %v258_v10 = vmax.f32 %v98_v57, 0.0 }
  0xa4   :  { %v269_v62 = vmax.f32 %v162_v55, 0.0  ;;  %v262_v63 = vmax.f32 %v120_v58, 0.0  ;;  %v417_v58 = vlaneseq }
  0xa5   :  { %v319_v59 = vsel %vm288_vm2, %v265_v56, 0.0  ;;  %v298_v16 = vsel %vm288_vm2, %v258_v10, 0.0 }
  0xa6   :  { %329 = vadd.xlane.f32.xlu0 %v328_v61  ;;  %v331_v4 = vsel %vm288_vm2, %v269_v62, 0.0  ;;  %v310_v6 = vsel %vm288_vm2, %v262_v63, 0.0  ;;  %v748_v61 = vand.u32 127, %v417_v58 }
  0xa7   :  { %320 = vadd.xlane.f32.xlu1 %v319_v59  ;;  %308 = vadd.xlane.f32.xlu2 %v307_v60 }
  0xa8   :  { %v751_v62 = vadd.s32 4294967288, %v748_v61 }
  0xaa   :  { %v142_v0 = vpop.f32.mrf.mxu2  ;;  %v179_v3 = vpop.f32.mrf.mxu0 }
  0xab   :  { %v266_v1 = vmax.f32 %v142_v0, 0.0  ;;  %v164_v2 = vpop.f32.mrf.mxu3  ;;  %v201_v7 = vpop.f32.mrf.mxu1  ;;  %v271_v8 = vmax.f32 %v179_v3, 0.0 }
  0xac   :  { %v275_v9 = vmax.f32 %v201_v7, 0.0  ;;  %v270_v19 = vmax.f32 %v164_v2, 0.0 }
  0xad   :  { %v322_v5 = vsel %vm288_vm2, %v266_v1, 0.0  ;;  %v337_v12 = vsel %vm288_vm2, %v271_v8, 0.0 }
  0xae   :  { %311 = vadd.xlane.f32.xlu0 %v310_v6  ;;  %v349_v11 = vsel %vm288_vm2, %v275_v9, 0.0  ;;  %v334_v25 = vsel %vm288_vm2, %v270_v19, 0.0 }
  0xaf   :  { %323 = vadd.xlane.f32.xlu1 %v322_v5  ;;  %332 = vadd.xlane.f32.xlu2 %v331_v4 }
  0xb2   :  { %v223_v13 = vpop.f32.mrf.mxu2  ;;  %v181_v15 = vpop.f32.mrf.mxu0 }
  0xb3   :  { %v245_v14 = vpop.f32.mrf.mxu3  ;;  %v272_v18 = vmax.f32 %v181_v15, 0.0  ;;  %v203_v21 = vpop.f32.mrf.mxu1  ;;  %v279_v28 = vmax.f32 %v223_v13, 0.0 }
  0xb4   :  { %v283_v17 = vmax.f32 %v245_v14, 0.0  ;;  %v276_v36 = vmax.f32 %v203_v21, 0.0  ;;  %v757_v14 = vadd.s32 4294967280, %v748_v61 }
  0xb5   :  { %v340_v22 = vsel %vm288_vm2, %v272_v18, 0.0  ;;  %v361_v33 = vsel %vm288_vm2, %v279_v28, 0.0 }
  0xb6   :  { %338 = vadd.xlane.f32.xlu0 %v337_v12  ;;  %v373_v20 = vsel %vm288_vm2, %v283_v17, 0.0  ;;  %v352_v43 = vsel %vm288_vm2, %v276_v36, 0.0  ;;  %v594_v17 = vld [vmem:[%s833_s2 + $0x8] sm:$0xff] }
  0xb7   :  { %350 = vadd.xlane.f32.xlu1 %v349_v11  ;;  %299 = vadd.xlane.f32.xlu2 %v298_v16  ;;  %v761_v16 = vadd.s32 4294967272, %v748_v61 }
  0xb8   :  { %533 = vmatpush.bf16.msra.mxu0 %v594_v17 }
  0xba   :  { %v225_v23 = vpop.f32.mrf.mxu2  ;;  %v184_v29 = vpop.f32.mrf.mxu0 }
  0xbb   :  { %v247_v24 = vpop.f32.mrf.mxu3  ;;  %v280_v26 = vmax.f32 %v225_v23, 0.0  ;;  %v206_v30 = vpop.f32.mrf.mxu1  ;;  %v273_v34 = vmax.f32 %v184_v29, 0.0 }
  0xbc   :  { %v284_v27 = vmax.f32 %v247_v24, 0.0  ;;  %v277_v35 = vmax.f32 %v206_v30, 0.0 }
  0xbd   :  { %v364_v31 = vsel %vm288_vm2, %v280_v26, 0.0  ;;  %v343_v38 = vsel %vm288_vm2, %v273_v34, 0.0 }
  0xbe   :  { %374 = vadd.xlane.f32.xlu0 %v373_v20  ;;  %v376_v32 = vsel %vm288_vm2, %v284_v27, 0.0  ;;  %v355_v37 = vsel %vm288_vm2, %v277_v35, 0.0 }
  0xbf   :  { %341 = vadd.xlane.f32.xlu1 %v340_v22  ;;  %335 = vadd.xlane.f32.xlu2 %v334_v25 }
  0xc2   :  { %v228_v40 = vpop.f32.mrf.mxu2  ;;  %v186_v41 = vpop.f32.mrf.mxu0 }
  0xc3   :  { %v250_v39 = vpop.f32.mrf.mxu3  ;;  %v208_v42 = vpop.f32.mrf.mxu1  ;;  %v281_v44 = vmax.f32 %v228_v40, 0.0  ;;  %v274_v45 = vmax.f32 %v186_v41, 0.0 }
  0xc4   :  { %v278_v46 = vmax.f32 %v208_v42, 0.0  ;;  %v285_v52 = vmax.f32 %v250_v39, 0.0  ;;  %v656_v42 = vmov 0.0  }
  0xc5   :  { %v367_v47 = vsel %vm288_vm2, %v281_v44, 0.0  ;;  %v346_v49 = vsel %vm288_vm2, %v274_v45, 0.0  ;;  %40 = vst.msk [vmem:[#allocation2] sm:$0xff] %vm39_vm8, %v656_v42 }
  0xc6   :  { %365 = vadd.xlane.f32.xlu0 %v364_v31  ;;  %v358_v48 = vsel %vm288_vm2, %v278_v46, 0.0  ;;  %v379_v56 = vsel %vm288_vm2, %v285_v52, 0.0  ;;  %v593_v52 = vld [vmem:[%s833_s2] sm:$0xff] }
  0xc7   :  { %377 = vadd.xlane.f32.xlu1 %v376_v32  ;;  %362 = vadd.xlane.f32.xlu2 %v361_v33 }
  0xc8   :  { %534 = vmatpush.bf16.msra.mxu0 %v593_v52 }
  0xca   :  { %v230_v51 = vpop.f32.mrf.mxu2 }
  0xcb   :  { %v252_v50 = vpop.f32.mrf.mxu3  ;;  %v282_v54 = vmax.f32 %v230_v51, 0.0 }
  0xcc   :  { %v286_v53 = vmax.f32 %v252_v50, 0.0 }
  0xcd   :  { %v370_v57 = vsel %vm288_vm2, %v282_v54, 0.0 }
  0xce   :  { %344 = vadd.xlane.f32.xlu0 %v343_v38  ;;  %v382_v55 = vsel %vm288_vm2, %v286_v53, 0.0 }
  0xcf   :  { %356 = vadd.xlane.f32.xlu1 %v355_v37  ;;  %353 = vadd.xlane.f32.xlu2 %v352_v43 }
  0xd6   :  { %347 = vadd.xlane.f32.xlu0 %v346_v49 }
  0xd7   :  { %359 = vadd.xlane.f32.xlu1 %v358_v48  ;;  %368 = vadd.xlane.f32.xlu2 %v367_v47 }
  0xde   :  { %380 = vadd.xlane.f32.xlu0 %v379_v56 }
  0xdf   :  { %383 = vadd.xlane.f32.xlu1 %v382_v55  ;;  %371 = vadd.xlane.f32.xlu2 %v370_v57 }
 0x101   :  { %v291_v60 = vpop.xlane.xlu0 %290 }
 0x102   :  { %v303_v59 = vpop.xlane.xlu1 %302  ;;  %v419_v18 = vperm.slane %v291_v60, %v748_v61 }
 0x103   :  { %v432_v2 = vperm.slane %v303_v59, %v748_v61 }
 0x109   :  { %v315_v1 = vpop.xlane.xlu0 %314 }
 0x10a   :  { %v327_v63 = vpop.xlane.xlu2 %326  ;;  %v306_v0 = vpop.xlane.xlu1 %305  ;;  %v439_v27 = vperm.slane %v315_v1, %v748_v61 }
 0x10b   :  { %v433_v3 = vperm.slane %v306_v0, %v751_v62  ;;  %v446_v43 = vperm.slane %v327_v63, %v748_v61 }
 0x10d   :  { %v434_v4 = vsel %vm422_vm3, %v433_v3, %v432_v2 }
 0x111   :  { %v294_v6 = vpop.xlane.xlu0 %293 }
 0x112   :  { %v318_v5 = vpop.xlane.xlu1 %317  ;;  %v297_v7 = vpop.xlane.xlu2 %296  ;;  %v421_v15 = vperm.slane %v294_v6, %v751_v62 }
 0x113   :  { %v440_v19 = vperm.slane %v318_v5, %v751_v62  ;;  %v425_v20 = vperm.slane %v297_v7, %v757_v14 }
 0x114   :  { %v423_v22 = vsel %vm422_vm3, %v421_v15, %v419_v18 }
 0x115   :  { %v441_v31 = vsel %vm422_vm3, %v440_v19, %v439_v27  ;;  %v427_v32 = vsel %vm426_vm4, %v425_v20, %v423_v22 }
 0x119   :  { %v330_v9 = vpop.xlane.xlu0 %329 }
 0x11a   :  { %v321_v8 = vpop.xlane.xlu1 %320  ;;  %v309_v10 = vpop.xlane.xlu2 %308  ;;  %v447_v39 = vperm.slane %v330_v9, %v751_v62 }
 0x11b   :  { %v435_v21 = vperm.slane %v309_v10, %v757_v14  ;;  %v442_v23 = vperm.slane %v321_v8, %v757_v14 }
 0x11c   :  { %v448_v47 = vsel %vm422_vm3, %v447_v39, %v446_v43 }
 0x11d   :  { %v436_v33 = vsel %vm426_vm4, %v435_v21, %v434_v4  ;;  %v443_v34 = vsel %vm426_vm4, %v442_v23, %v441_v31 }
 0x121   :  { %v312_v12 = vpop.xlane.xlu0 %311 }
 0x122   :  { %v324_v11 = vpop.xlane.xlu1 %323  ;;  %v333_v13 = vpop.xlane.xlu2 %332  ;;  %v437_v24 = vperm.slane %v312_v12, %v761_v16 }
 0x123   :  { %v444_v28 = vperm.slane %v324_v11, %v761_v16  ;;  %v449_v41 = vperm.slane %v333_v13, %v757_v14 }
 0x124   :  { %v438_v35 = vsel %vm430_vm5, %v437_v24, %v436_v33  ;;  %v287_v33 = vld [vmem:[#allocation2] sm:$0xff] }
 0x125   :  { %v445_v37 = vsel %vm430_vm5, %v444_v28, %v443_v34  ;;  %v450_v49 = vsel %vm426_vm4, %v449_v41, %v448_v47 }
 0x129   :  { %v339_v26 = vpop.xlane.xlu0 %338 }
 0x12a   :  { %v351_v25 = vpop.xlane.xlu1 %350  ;;  %v300_v29 = vpop.xlane.xlu2 %299  ;;  %v453_v3 = vperm.slane %v339_v26, %v748_v61 }
 0x12b   :  { %v429_v30 = vperm.slane %v300_v29, %v761_v16  ;;  %v460_v5 = vperm.slane %v351_v25, %v748_v61 }
 0x12d   :  { %v431_v36 = vsel %vm430_vm5, %v429_v30, %v427_v32 }
 0x12e   :  { %v482_v38 = vsel %vm481_vm6, %v438_v35, %v431_v36 }
 0x12f   :  { %v484_v40 = vsel %vm483_vm7, %v445_v37, %v482_v38 }
 0x131   :  { %v375_v44 = vpop.xlane.xlu0 %374 }
 0x132   :  { %v342_v45 = vpop.xlane.xlu1 %341  ;;  %v336_v46 = vpop.xlane.xlu2 %335  ;;  %v474_v18 = vperm.slane %v375_v44, %v748_v61 }
 0x133   :  { %v451_v48 = vperm.slane %v336_v46, %v761_v16  ;;  %v454_v59 = vperm.slane %v342_v45, %v751_v62 }
 0x135   :  { %v452_v50 = vsel %vm430_vm5, %v451_v48, %v450_v49  ;;  %v455_v6 = vsel %vm422_vm3, %v454_v59, %v453_v3 }
 0x136   :  { %v486_v51 = vsel %vm485_vm9, %v452_v50, %v484_v40 }
 0x139   :  { %v366_v53 = vpop.xlane.xlu0 %365 }
 0x13a   :  { %v378_v54 = vpop.xlane.xlu1 %377  ;;  %v363_v55 = vpop.xlane.xlu2 %362  ;;  %v468_v12 = vperm.slane %v366_v53, %v751_v62 }
 0x13b   :  { %v467_v11 = vperm.slane %v363_v55, %v748_v61  ;;  %v475_v13 = vperm.slane %v378_v54, %v751_v62 }
 0x13d   :  { %v476_v27 = vsel %vm422_vm3, %v475_v13, %v474_v18 }
 0x141   :  { %v345_v57 = vpop.xlane.xlu0 %344 }
 0x142   :  { %v357_v56 = vpop.xlane.xlu1 %356  ;;  %v354_v58 = vpop.xlane.xlu2 %353  ;;  %v456_v1 = vperm.slane %v345_v57, %v757_v14 }
 0x143   :  { %v461_v0 = vperm.slane %v354_v58, %v751_v62  ;;  %v463_v7 = vperm.slane %v357_v56, %v757_v14  ;;  %v469_v62 = vsel %vm422_vm3, %v468_v12, %v467_v11 }
 0x144   :  { %v457_v9 = vsel %vm426_vm4, %v456_v1, %v455_v6 }
 0x145   :  { %v462_v8 = vsel %vm422_vm3, %v461_v0, %v460_v5 }
 0x146   :  { %v464_v19 = vsel %vm426_vm4, %v463_v7, %v462_v8 }
 0x149   :  { %v348_v63 = vpop.xlane.xlu0 %347 }
 0x14a   :  { %v360_v60 = vpop.xlane.xlu1 %359  ;;  %v369_v2 = vpop.xlane.xlu2 %368  ;;  %v458_v4 = vperm.slane %v348_v63, %v761_v16 }
 0x14b   :  { %v465_v10 = vperm.slane %v360_v60, %v761_v16  ;;  %v470_v17 = vperm.slane %v369_v2, %v757_v14 }
 0x14c   :  { %v459_v15 = vsel %vm430_vm5, %v458_v4, %v457_v9 }
 0x14d   :  { %v466_v22 = vsel %vm430_vm5, %v465_v10, %v464_v19  ;;  %v488_v23 = vsel %vm487_vm10, %v459_v15, %v486_v51  ;;  %v471_v28 = vsel %vm426_vm4, %v470_v17, %v469_v62 }
 0x14e   :  { %v490_v31 = vsel %vm489_vm11, %v466_v22, %v488_v23 }
 0x151   :  { %v381_v21 = vpop.xlane.xlu0 %380 }
 0x152   :  { %v384_v20 = vpop.xlane.xlu1 %383  ;;  %v372_v24 = vpop.xlane.xlu2 %371  ;;  %v477_v26 = vperm.slane %v381_v21, %v757_v14 }
 0x153   :  { %v479_v25 = vperm.slane %v384_v20, %v761_v16  ;;  %v472_v61 = vperm.slane %v372_v24, %v761_v16  ;;  %v600_v16 = vld [vmem:[%s834_s3] ss:$0 sm:$0xff] }
 0x154   :  { %v478_v29 = vsel %vm426_vm4, %v477_v26, %v476_v27 }
 0x155   :  { %v473_v30 = vsel %vm430_vm5, %v472_v61, %v471_v28  ;;  %v480_v32 = vsel %vm430_vm5, %v479_v25, %v478_v29 }
 0x156   :  { %v492_v14 = vsel %vm491_vm12, %v473_v30, %v490_v31 }
 0x157   :  { %v494_v34 = vsel %vm493_vm13, %v480_v32, %v492_v14 }
 0x158   :  { %v496_v35 = vadd.f32 %v494_v34, %v287_v33 }
 0x15a   :  { %498 = vst.msk [vmem:[#allocation2] sm:$0xff] %vm39_vm8, %v496_v35 }
 0x161   :  { %v502_v36 = vld [vmem:[#allocation2] sm:$0xff] }
 0x162   :  { %v503_v37 = vpack.c.bf16 %v502_v36, %v502_v36 }
 0x164   :  { %590 = vmatmul.msk.bf16.vlgmr.msra.gmra.mxu0 %vm39_vm8, %v503_v37 }
 0x1e1   :  { %v536_v38 = vpop.f32.mrf.mxu0 }
 0x1e2   :  { %v537_v39 = vadd.f32 %v600_v16, %v536_v38 }
 0x1e4   :  { %540 = vst [vmem:[#allocation6] sm:$0xff] %v537_v39 }
 0x1e5   :  { %551 = dma.vmem_to_hbm [thread:$0]  %s547_s30, 128, %s549_s7, [#allocation5]  }
 0x1e9   :  { %v538_v40 = vpop.f32.mrf.mxu0 }
 0x1ea   :  { %651 = dma.done.wait [#allocation5], 128  }
 0x1eb   :  { %652 = vsyncadd [#allocation5], 4294967168 }
 0x1ec   :  { %556 = vsyncpa [#allocation4], 1 }
 0x1ed   :  { %557 = vsyncpa [#allocation5], 1 }

</bundles_post_ra>
